<compile_context>
chip_gen: v6e
topology: v6e:2x2x1
jax: 0.10.0
libtpu: 0.0.40
codegen_flags: <defaults>
</compile_context>

<pallas_src>
import math
import numpy as np
import jax
import jax.numpy as jnp
from jax import lax
from jax.experimental import pallas as pl
from jax.experimental.pallas import tpu as pltpu

BN_EPS = 1e-5
# eval-mode BatchNorm1d(affine=False): running_mean=0, running_var=1 at init
BN_SCALE = 1.0 / math.sqrt(1.0 + BN_EPS)


# ---------------------------------------------------------------------------
# Small helpers
# ---------------------------------------------------------------------------
_NUM_TC_CACHE = None


def _num_tensorcores():
    """2 on v7x (two TensorCores per chip), else 1."""
    global _NUM_TC_CACHE
    if _NUM_TC_CACHE is None:
        cores = 1
        try:
            kind = jax.devices()[0].device_kind.lower()
            if "v7" in kind or "7x" in kind:
                cores = 2
        except Exception:
            cores = 1
        _NUM_TC_CACHE = cores
    return _NUM_TC_CACHE


def _gelu_tanh(x):
    # tanh-approx GELU (see TODO above re: exact erf form)
    c = math.sqrt(2.0 / math.pi)
    return 0.5 * x * (1.0 + jnp.tanh(c * (x + 0.044715 * x * x * x)))


def _pick_tile_m(R, max_tile=4096):
    """Largest multiple-of-8 divisor of R (<= max_tile).  Single-TC chips
    (v5e/v6e) keep one big tile (amortize ~0.35us/step); on v7x prefer an even
    number of grid steps so the parallel row grid balances both TensorCores."""
    cap = min(max_tile, R)
    best = 0
    for cand in range(8, cap + 1, 8):
        if R % cand == 0:
            best = cand
    if best == 0:
        # fallback: pad rows up to a multiple of 8 (tiny / ragged R only)
        return min(max_tile, max(8, ((R + 7) // 8) * 8))
    if _num_tensorcores() > 1:
        for cand in range(best, 7, -8):
            if R % cand == 0 and (R // cand) % 2 == 0:
                return cand
    return best


# ---------------------------------------------------------------------------
# Torch-compatible bilinear (align_corners=False) interpolation matrices.
# ---------------------------------------------------------------------------
_RESIZE_MAT = {}
_HPAD_MAT = {}


def _bilinear_weights(in_size, out_cols):
    scale = in_size / len(out_cols) if False else None  # placeholder (unused)


def _resize_matrix(in_size, out_size):
    """(out_size, in_size) matrix reproducing torch bilinear align_corners=False."""
    key = (in_size, out_size)
    M = _RESIZE_MAT.get(key)
    if M is None:
        j = np.arange(out_size)
        scale = in_size / out_size
        s = np.maximum((j + 0.5) * scale - 0.5, 0.0)
        i0 = np.floor(s).astype(np.int64)
        i1 = np.minimum(i0 + 1, in_size - 1)
        w1 = (s - i0).astype(np.float32)
        Mnp = np.zeros((out_size, in_size), np.float32)
        Mnp[j, i0] += (1.0 - w1)
        Mnp[j, i1] += w1
        M = jnp.asarray(Mnp)
        _RESIZE_MAT[key] = M
    return M


def _h_pad_matrix(in_w, need_w, target_w):
    """(target_w, in_w) matrix: horizontal resize to need_w then center-pad
    (need_w < target_w) or crop to the first target_w columns (need_w >= target_w),
    exactly as the reference padding_resize does per image."""
    key = (in_w, need_w, target_w)
    M = _HPAD_MAT.get(key)
    if M is None:
        Mnp = np.zeros((target_w, in_w), np.float32)
        if need_w < target_w:
            cols = np.arange(need_w)
            off = (target_w - need_w) // 2
        else:
            cols = np.arange(target_w)
            off = 0
        scale = in_w / need_w
        s = np.maximum((cols + 0.5) * scale - 0.5, 0.0)
        i0 = np.floor(s).astype(np.int64)
        i1 = np.minimum(i0 + 1, in_w - 1)
        w1 = (s - i0).astype(np.float32)
        Mnp[cols + off, i0] += (1.0 - w1)
        Mnp[cols + off, i1] += w1
        M = Mnp
        _HPAD_MAT[key] = M
    return M


def padding_resize(x, ratios, target_h, target_w):
    """Batched equivalent of the reference per-image loop: one shared vertical
    resize matrix + one per-image horizontal resize/pad/crop matrix (ratios are
    concrete host values, mirroring the reference .tolist())."""
    ratios_np = np.asarray(jax.device_get(ratios), dtype=np.float32).reshape(-1)
    N, C, h, w = x.shape
    Mv = _resize_matrix(h, target_h)                               # (target_h, h)
    Mh = jnp.asarray(np.stack(
        [_h_pad_matrix(w, int(np.float32(target_h) * r), target_w)
         for r in ratios_np]))                                     # (N, target_w, w)
    y = jnp.einsum('Hh,nchw->ncHw', Mv, x)
    y = jnp.einsum('nWw,ncHw->ncHW', Mh, y)
    return y


# ---------------------------------------------------------------------------
# Pallas kernels
# ---------------------------------------------------------------------------
def _linear_kernel(x_ref, w_ref, b_ref, o_ref):
    o_ref[...] = (jnp.dot(x_ref[...].astype(w_ref.dtype), w_ref[...],
                          preferred_element_type=jnp.float32)
                  + b_ref[...]).astype(o_ref.dtype)


def pallas_linear(x, w, b, max_tile=4096):
    """y = x @ w + b, rows tiled; x is f32 (cast to the weight dtype in-kernel)."""
    R, K = x.shape
    M = w.shape[1]
    tile = _pick_tile_m(R, max_tile)
    Rp = ((R + tile - 1) // tile) * tile
    xp = x if Rp == R else jnp.pad(x, ((0, Rp - R), (0, 0)))
    out = pl.pallas_call(
        _linear_kernel,
        out_shape=jax.ShapeDtypeStruct((Rp, M), jnp.float32),
        grid=(Rp // tile,),
        in_specs=[pl.BlockSpec((tile, K), lambda i: (i, 0)),
                  pl.BlockSpec((K, M), lambda i: (0, 0)),
                  pl.BlockSpec((1, M), lambda i: (0, 0))],
        out_specs=pl.BlockSpec((tile, M), lambda i: (i, 0)),
        compiler_params=pltpu.CompilerParams(
            dimension_semantics=("parallel",)),
    )(xp, w, b.reshape(1, -1))
    return out if Rp == R else out[:R]


def _make_masked_softmax_distill_kernel(t_dim):
    """Body branch: BN -> Linear -> BN -> GELU -> Linear -> softmax, masked by
    the resize mask.  Output slab is only 8 f32 columns wide (cols >= t_dim zero)."""
    def kernel(x_ref, mk_ref, w1_ref, b1_ref, w2_ref, b2_ref, o_ref):
        xb = x_ref[...].astype(jnp.bfloat16)
        h = jnp.dot(xb, w1_ref[...],
                    preferred_element_type=jnp.float32) + b1_ref[...]
        h = _gelu_tanh(h)
        y = jnp.dot(h.astype(jnp.bfloat16), w2_ref[...],
                    preferred_element_type=jnp.float32) + b2_ref[...]
        col = lax.broadcasted_iota(jnp.int32, y.shape, 1)
        valid = col < t_dim
        m = jnp.max(jnp.where(valid, y, -1e30), axis=-1, keepdims=True)
        e = jnp.where(valid, jnp.exp(y - m), 0.0)
        soft = e * pl.reciprocal(jnp.sum(e, axis=-1, keepdims=True), approx=True)
        mk = (mk_ref[...] != 0.0).astype(jnp.float32)
        o_ref[...] = (soft * mk).astype(o_ref.dtype)
    return kernel


def _make_part_rgb_kernel(t_part, t_rgb):
    """Fused Denoising (softmax over cols [0,t_part)) + Appearance (sigmoid over
    cols [t_part, t_part+t_rgb)) sharing one read of the 128-wide slab and ONE
    exp: z = where(pmask, y-m, -y); e = exp(z) drives both softmax and sigmoid.
    Output is exactly t_part+t_rgb f32 columns, masked by foreground."""
    del t_rgb  # output width == t_part + t_rgb; all non-part cols are rgb cols

    def kernel(x_ref, fg_ref, w1_ref, b1_ref, w2_ref, b2_ref, o_ref):
        xb = x_ref[...].astype(jnp.bfloat16)
        h = jnp.dot(xb, w1_ref[...],
                    preferred_element_type=jnp.float32) + b1_ref[...]
        h = _gelu_tanh(h)
        y = jnp.dot(h.astype(jnp.bfloat16), w2_ref[...],
                    preferred_element_type=jnp.float32) + b2_ref[...]
        col = lax.broadcasted_iota(jnp.int32, y.shape, 1)
        pmask = col < t_part
        m = jnp.max(jnp.where(pmask, y, -1e30), axis=-1, keepdims=True)
        z = jnp.where(pmask, y - m, -y)
        e = jnp.exp(z)
        e_soft = jnp.where(pmask, e, 0.0)
        soft = e_soft * pl.reciprocal(jnp.sum(e_soft, axis=-1, keepdims=True),
                                      approx=True)
        sig = pl.reciprocal(1.0 + e, approx=True)       # sigmoid(y) on rgb cols
        fg = (fg_ref[...] != 0.0).astype(jnp.float32)
        o_ref[...] = (jnp.where(pmask, soft, sig) * fg).astype(o_ref.dtype)
    return kernel


def pallas_distill(kernel_fn, x, row_mask, w1, b1, w2, b2, max_tile=4096):
    """Run a fused eval-mode infoDistillation kernel over rows of x (f32)."""
    R, S = x.shape
    mid = w1.shape[1]
    out_w = w2.shape[1]
    tile = _pick_tile_m(R, max_tile)
    Rp = ((R + tile - 1) // tile) * tile
    if Rp != R:
        x = jnp.pad(x, ((0, Rp - R), (0, 0)))
        row_mask = jnp.pad(row_mask, ((0, Rp - R), (0, 0)))
    out = pl.pallas_call(
        kernel_fn,
        out_shape=jax.ShapeDtypeStruct((Rp, out_w), jnp.float32),
        grid=(Rp // tile,),
        in_specs=[pl.BlockSpec((tile, S), lambda i: (i, 0)),
                  pl.BlockSpec((tile, 1), lambda i: (i, 0)),
                  pl.BlockSpec((S, mid), lambda i: (0, 0)),
                  pl.BlockSpec((1, mid), lambda i: (0, 0)),
                  pl.BlockSpec((mid, out_w), lambda i: (0, 0)),
                  pl.BlockSpec((1, out_w), lambda i: (0, 0))],
        out_specs=pl.BlockSpec((tile, out_w), lambda i: (i, 0)),
        compiler_params=pltpu.CompilerParams(
            dimension_semantics=("parallel",)),
    )(x, row_mask, w1, b1, w2, b2)
    return out if Rp == R else out[:R]


def _sobel_kernel(x_ref, m_ref, o_ref):
    """Whole-batch |Sobel| reduction; batch folded onto the lane axis."""
    x = x_ref[...]
    Hp, L = x.shape
    Hc, Lc = Hp - 2, L - 2

    def sl(a, b):
        return x[a:a + Hc, b:b + Lc]

    # Sobel X: [[1,0,-1],[2,0,-2],[1,0,-1]]   Sobel Y: [[1,2,1],[0,0,0],[-1,-2,-1]]
    gx = (sl(0, 0) - sl(0, 2)) + 2.0 * (sl(1, 0) - sl(1, 2)) + (sl(2, 0) - sl(2, 2))
    gy = (sl(0, 0) - sl(2, 0)) + 2.0 * (sl(0, 1) - sl(2, 1)) + (sl(0, 2) - sl(2, 2))
    v = (jnp.abs(gx) + jnp.abs(gy)) * m_ref[...]
    tot = jnp.sum(v, axis=1, keepdims=True)
    o_ref[...] = jnp.sum(tot, axis=0, keepdims=True)


def pallas_sobel_abs_sum(slab, Wp):
    """slab: (H+2, N*(W+2)) f32, each image zero-padded by 1 and laid side-by-side
    along lanes.  The per-image zero pad makes the +/-1 column shifts safe at
    valid output positions; a lane mask removes the (garbage) pad positions."""
    Hp, L = slab.shape
    Lc = L - 2
    q = (np.arange(Lc) + 1) % Wp
    lane_mask = ((q >= 1) & (q <= Wp - 2)).astype(np.float32).reshape(1, Lc)
    out = pl.pallas_call(
        _sobel_kernel,
        out_shape=jax.ShapeDtypeStruct((1, 1), jnp.float32),
        grid=(1,),
        in_specs=[pl.BlockSpec((Hp, L), lambda i: (0, 0)),
                  pl.BlockSpec((1, Lc), lambda i: (0, 0))],
        out_specs=pl.BlockSpec((1, 1), lambda i: (0, 0)),
        compiler_params=pltpu.CompilerParams(
            dimension_semantics=("arbitrary",)),
    )(slab, jnp.asarray(lane_mask))
    return out[0, 0]


def _gait_head_kernel(x_ref, we_ref, be_ref, wc_ref, bc_ref, emb_ref, log_ref):
    e = jnp.dot(x_ref[...], we_ref[...],
                preferred_element_type=jnp.float32) + be_ref[...]
    emb_ref[...] = e.astype(emb_ref.dtype)
    log_ref[...] = (jnp.dot(e, wc_ref[...],
                            preferred_element_type=jnp.float32)
                    + bc_ref[...]).astype(log_ref.dtype)


def pallas_gait_head(feat, we, be, wc, bc):
    n, K = feat.shape
    E, Cc = we.shape[1], wc.shape[1]
    npad = max(8, ((n + 7) // 8) * 8)
    if npad != n:
        feat = jnp.pad(feat, ((0, npad - n), (0, 0)))
    emb, log = pl.pallas_call(
        _gait_head_kernel,
        out_shape=(jax.ShapeDtypeStruct((npad, E), jnp.float32),
                   jax.ShapeDtypeStruct((npad, Cc), jnp.float32)),
        grid=(1,),
        in_specs=[pl.BlockSpec((npad, K), lambda i: (0, 0)),
                  pl.BlockSpec((K, E), lambda i: (0, 0)),
                  pl.BlockSpec((1, E), lambda i: (0, 0)),
                  pl.BlockSpec((E, Cc), lambda i: (0, 0)),
                  pl.BlockSpec((1, Cc), lambda i: (0, 0))],
        out_specs=(pl.BlockSpec((npad, E), lambda i: (0, 0)),
                   pl.BlockSpec((npad, Cc), lambda i: (0, 0))),
        compiler_params=pltpu.CompilerParams(
            dimension_semantics=("arbitrary",)),
    )(feat, we, be.reshape(1, -1), wc, bc.reshape(1, -1))
    return emb[:n], log[:n]


# ---------------------------------------------------------------------------
# Model
# ---------------------------------------------------------------------------
MODEL_CFG = dict(
    pretrained_dinov2=None, pretrained_mask_branch=None, pretrained_biggait=None,
    image_size=28, sils_size=16,
    Mask_Branch=dict(source_dim=32, target_dim=2, p=0.0,
                     softmax=True, Relu=True, Up=False),
    Appearance_Branch=dict(source_dim=128, target_dim=16, p=0.0,
                           softmax=False, Relu=True, Up=False),
    Denoising_Branch=dict(source_dim=128, target_dim=8, p=0.0,
                          softmax=True, Relu=True, Up=False),
)


class BigGaitDinov2GaitbasePallas:
    def __init__(self, model_cfg, key):
        self.cfg = model_cfg
        self.image_size = model_cfg['image_size']
        self.sils_size = model_cfg['sils_size']
        self.f4_dim = model_cfg['Mask_Branch']['source_dim']
        self.fc_dim = self.f4_dim * 4
        self.mask_dim = model_cfg['Mask_Branch']['target_dim']
        self.app_dim = model_cfg['Appearance_Branch']['target_dim']
        self.denoising_dim = model_cfg['Denoising_Branch']['target_dim']
        self._body_kernel = _make_masked_softmax_distill_kernel(self.mask_dim)
        self._part_rgb_kernel = _make_part_rgb_kernel(self.denoising_dim,
                                                      self.app_dim)
        self.params = self._init_parameters(key)

    # --- deterministic init (xavier_uniform weights, zero bias); eval-mode BN
    #     scale constants folded into the weights at init time ---
    def _init_parameters(self, key):
        def lin(k, fan_in, fan_out):
            bound = math.sqrt(6.0 / (fan_in + fan_out))
            w = jax.random.uniform(k, (fan_in, fan_out), jnp.float32,
                                   -bound, bound)
            return w, jnp.zeros((fan_out,), jnp.float32)

        def distill_raw(k, S, T):
            k1, k2 = jax.random.split(k)
            w1, b1 = lin(k1, S, S // 2)
            w2, b2 = lin(k2, S // 2, T)
            return w1, b1, w2, b2

        keys = iter(jax.random.split(key, 16))
        patch_dim = 3 * 14 * 14                       # 588 (no K padding)
        p = {}

        # --- fused backbone projection: patch_embed + 4x mid4 -> 160 cols ---
        out_dim = self.f4_dim + self.fc_dim           # 160 (no N padding)
        w_pe, b_pe = lin(next(keys), patch_dim, self.f4_dim)
        mids = [lin(next(keys), patch_dim, self.f4_dim) for _ in range(4)]
        Wb = jnp.zeros((patch_dim, out_dim), jnp.float32)
        bb = jnp.zeros((out_dim,), jnp.float32)
        Wb = Wb.at[:, :self.f4_dim].set(w_pe)
        bb = bb.at[:self.f4_dim].set(b_pe)
        for j, (wm, bm) in enumerate(mids):
            c0 = self.f4_dim * (j + 1)
            Wb = Wb.at[:, c0:c0 + self.f4_dim].set(wm)
            bb = bb.at[c0:c0 + self.f4_dim].set(bm)
        p['backbone_w'] = Wb.astype(jnp.bfloat16)
        p['backbone_b'] = bb

        # --- body branch (Mask_Branch): S=32, mid=16, T=2, softmax; out 8 wide ---
        BODY_OUT = 8
        w1, b1, w2, b2 = distill_raw(next(keys), self.f4_dim, self.mask_dim)
        w1f = (w1 * (BN_SCALE * BN_SCALE)).astype(jnp.bfloat16)   # bn_s + BN(mid)
        b1f = (b1 * BN_SCALE).reshape(1, -1)
        W2p = jnp.zeros((self.f4_dim // 2, BODY_OUT), jnp.float32)
        W2p = W2p.at[:, :self.mask_dim].set(w2).astype(jnp.bfloat16)
        b2p = jnp.zeros((BODY_OUT,), jnp.float32).at[:self.mask_dim].set(b2)
        p['body'] = (w1f, b1f, W2p, b2p.reshape(1, -1))

        # --- fused Denoising + Appearance branch: S=128, mid=64 each; out 24 ---
        mid = self.fc_dim // 2                        # 64
        pw1, pb1, pw2, pb2 = distill_raw(next(keys), self.fc_dim, self.denoising_dim)
        rw1, rb1, rw2, rb2 = distill_raw(next(keys), self.fc_dim, self.app_dim)
        W1c = jnp.zeros((self.fc_dim, 2 * mid), jnp.float32)
        W1c = W1c.at[:, :mid].set(pw1)
        W1c = W1c.at[:, mid:].set(rw1)
        W1c = (W1c * (BN_SCALE * BN_SCALE)).astype(jnp.bfloat16)  # bn_s + BN(mid)
        b1c = (jnp.concatenate([pb1, rb1]) * BN_SCALE).reshape(1, -1)
        out_w = self.denoising_dim + self.app_dim                 # 24
        W2c = jnp.zeros((2 * mid, out_w), jnp.float32)
        W2c = W2c.at[:mid, :self.denoising_dim].set(pw2)          # softmax: no bn_t
        W2c = W2c.at[mid:, self.denoising_dim:].set(rw2 * BN_SCALE)   # bn_t fold
        W2c = W2c.astype(jnp.bfloat16)
        b2c = jnp.zeros((out_w,), jnp.float32)
        b2c = b2c.at[:self.denoising_dim].set(pb2)
        b2c = b2c.at[self.denoising_dim:].set(rb2 * BN_SCALE)
        p['part_rgb'] = (W1c, b1c, W2c, b2c.reshape(1, -1))

        # --- gait head (stub for GaitBase) ---
        p['gait_fc'] = lin(next(keys), self.denoising_dim + self.app_dim, 64)
        p['gait_cls'] = lin(next(keys), 64, 8)
        return p

    # --- helpers mirroring the reference module ---
    def preprocess(self, x, image_size):
        Mv = _resize_matrix(x.shape[2], image_size * 2)
        Mh = _resize_matrix(x.shape[3], image_size)
        y = jnp.einsum('Hh,nchw->ncHw', Mv, x)
        return jnp.einsum('Ww,ncHw->ncHW', Mh, y)

    def backbone(self, x):
        # TODO(synk): substitute for DINOv2 vit_small -- fused 14x14 patch linear.
        N = x.shape[0]
        pd = 14
        gh, gw = x.shape[2] // pd, x.shape[3] // pd
        patches = x.reshape(N, 3, gh, pd, gw, pd)
        patches = patches.transpose(0, 2, 4, 1, 3, 5).reshape(N * gh * gw, 3 * pd * pd)
        out = pallas_linear(patches, self.params['backbone_w'],
                            self.params['backbone_b'])
        tok1 = out[:, :self.f4_dim]
        tok4 = out[:, self.f4_dim:]
        return tok1.reshape(N, gh * gw, -1), tok4.reshape(N, gh * gw, -1)

    def get_body(self, mask):
        f0 = mask[..., 0]
        cm = jnp.round(f0)
        edge = 5
        cnt = (jnp.sum(cm[:, :edge, :], axis=(1, 2))
               + jnp.sum(cm[:, -edge:, :], axis=(1, 2)))
        cond = cnt > (f0.shape[2] * edge)
        return jnp.where(cond[:, None, None], mask[..., 1], mask[..., 0])

    def get_edge(self, sils, threshold=1):
        mask_sils = jnp.round(sils * threshold)
        ninf = jnp.array(-jnp.inf, sils.dtype)
        pinf = jnp.array(jnp.inf, sils.dtype)
        dil = lax.reduce_window(mask_sils, ninf, lax.max,
                                (1, 1, 3, 3), (1, 1, 1, 1), 'SAME')
        ero = lax.reduce_window(dil, pinf, lax.min,
                                (1, 1, 5, 5), (1, 1, 1, 1), 'SAME')
        edge = jnp.logical_xor(dil > 0.5, ero > 0.5).astype(sils.dtype)
        return edge * sils + (ero > 0.5).astype(sils.dtype)

    def connect_loss(self, images, n, s, c):
        H, W = self.sils_size * 2, self.sils_size
        images = images.reshape(n * s, c, H, W)
        # conv weight repeats the same Sobel filter across channels -> sum channels
        summed = jnp.sum(images, axis=1).astype(jnp.float32)       # (N, H, W)
        padded = jnp.pad(summed, ((0, 0), (1, 1), (1, 1)))         # (N, H+2, W+2)
        slab = padded.transpose(1, 0, 2).reshape(H + 2, -1)        # batch on lanes
        total = pallas_sobel_abs_sum(slab, W + 2)
        return total / (n * s * c * H * W)

    def diversity_loss(self, images, max_p):
        p = jnp.sum(images, axis=1) / (jnp.sum(images, axis=(1, 2)) + 1e-6)[:, None]
        entropies = -jnp.sum(p * jnp.log2(p + 1e-6), axis=1)
        mp = jnp.full((max_p,), 1.0 / max_p, images.dtype)
        max_ent = -jnp.sum(mp * jnp.log2(mp))
        return jnp.mean(max_ent - entropies)

    def gait_net(self, damap, seqL):
        # TODO(synk): substitute for Baseline/GaitBase set network.
        x = jnp.max(damap, axis=2)                   # temporal (set) max pooling
        feat = jnp.mean(x, axis=(2, 3))              # (n, C)
        w_e, b_e = self.params['gait_fc']
        w_c, b_c = self.params['gait_cls']
        return pallas_gait_head(feat, w_e, b_e, w_c, b_c)

    # --- forward ---
    def forward(self, inputs, compute_losses=False):
        ipts, labs, ty, vi, seqL = inputs
        ratios = ipts[0]
        sils = ipts[1]
        n, s, c, h, w = sils.shape
        N = n * s
        H, W = self.sils_size * 2, self.sils_size
        sils = sils.reshape(N, c, h, w)

        outs = self.preprocess(padding_resize(sils, ratios, 256, 128),
                               self.image_size)
        tok1, tok4 = self.backbone(outs)
        gh, gw = self.image_size // 7, self.image_size // 14
        outs_last1 = tok1.reshape(n, s, gh, gw, -1).transpose(0, 1, 4, 2, 3)
        outs_last1 = outs_last1.reshape(N, -1, gh, gw)
        outs_last4 = tok4.reshape(n, s, gh, gw, -1).transpose(0, 1, 4, 2, 3)
        outs_last4 = outs_last4.reshape(N, -1, gh, gw)
        outs_last1 = self.preprocess(outs_last1, self.sils_size)
        outs_last4 = self.preprocess(outs_last4, self.sils_size)
        outs_last1 = outs_last1.reshape(N, -1, H * W).transpose(0, 2, 1)  # (N,HW,32)
        outs_last4 = outs_last4.reshape(N, -1, H * W).transpose(0, 2, 1)  # (N,HW,128)

        mask = jnp.ones((N, 1, H, W), jnp.float32)
        mask = padding_resize(mask, ratios, H, W)
        mask_col = mask.reshape(-1, 1)

        # Body branch.  Eval-mode BN uses running stats so per-row results are
        # independent: running on all rows and masking in-kernel is numerically
        # identical to the reference's gather / scatter of foreground rows.
        w1, b1, w2, b2 = self.params['body']
        fore_slab = pallas_distill(self._body_kernel,
                                   outs_last1.reshape(-1, self.f4_dim),
                                   mask_col, w1, b1, w2, b2)
        foreground = fore_slab[:, :self.mask_dim]
        if compute_losses:
            loss_connectivity_shape = self.connect_loss(foreground, n, s,
                                                        self.mask_dim)
        foreground = lax.stop_gradient(foreground)
        foreground = self.get_body(
            foreground.reshape(N, H, W, self.mask_dim)).reshape(N, -1)
        foreground = self.get_edge(
            foreground.reshape(N, 1, H, W)).reshape(N, -1)
        fg_col = foreground.reshape(-1, 1)

        # Fused Denoising + Appearance branch; slab cols [0,8) = denoising
        # (softmax), [8,24) = appearance (sigmoid), both masked by foreground.
        W1c, b1c, W2c, b2c = self.params['part_rgb']
        pr_slab = pallas_distill(self._part_rgb_kernel,
                                 outs_last4.reshape(-1, self.fc_dim),
                                 fg_col, W1c, b1c, W2c, b2c)

        if compute_losses:
            denosing = pr_slab[:, :self.denoising_dim]
            loss_connectivity_part = self.connect_loss(
                denosing.reshape(N, H * W, self.denoising_dim)[..., :-1]
                        .transpose(0, 2, 1),
                n, s, self.denoising_dim - 1)
            loss_diversity_part = self.diversity_loss(
                denosing.reshape(N, H * W, self.denoising_dim), self.denoising_dim)
            # Reference computes these and discards them (not in retval).
            _ = (loss_connectivity_shape, loss_connectivity_part,
                 loss_diversity_part)

        # slab column order already equals concat([dmap, amap], channel dim)
        damap = pr_slab.reshape(n, s, H, W, -1).transpose(0, 4, 1, 2, 3)
        embed_1, logits = self.gait_net(damap, seqL)

        retval = {'training_feat': {}, 'visual_summary': {},
                  'inference_feat': {'embeddings': embed_1}}
        return retval


if __name__ == "__main__":
    key = jax.random.PRNGKey(0)
    k_param, k_sils, k_ratio = jax.random.split(key, 3)
    model = BigGaitDinov2GaitbasePallas(MODEL_CFG, k_param)

    n, s, c, h, w = 2, 2, 3, 64, 32
    sils = jax.random.uniform(k_sils, (n, s, c, h, w), jnp.float32)
    ratios = jax.random.uniform(k_ratio, (n, s), jnp.float32, 0.45, 0.62)

    inputs = ([ratios, sils], None, None, None, None)
    retval = model.forward(inputs)
    emb = jax.block_until_ready(retval['inference_feat']['embeddings'])
    assert emb.shape == (n, 64), emb.shape
    assert bool(jnp.all(jnp.isfinite(emb)))
    print("KERNEL_OK")
</pallas_src>

<mosaic_0001>
module attributes {stable_mosaic.version = 11 : i64} {
  func.func @_linear_kernel(%arg0: i32, %arg1: memref<32x588xf32, #tpu.memory_space<vmem>>, %arg2: memref<588x160xbf16, #tpu.memory_space<vmem>>, %arg3: memref<1x160xf32, #tpu.memory_space<vmem>>, %arg4: memref<32x160xf32, #tpu.memory_space<vmem>>) attributes {dimension_semantics = [#tpu.dimension_semantics<parallel>], iteration_bounds = array<i64: 1>, scalar_prefetch = 0 : i64, scratch_operands = 0 : i64, tpu.core_type = #tpu.core_type<tc>, window_params = [{transform_indices = @transform_0, window_bounds = array<i64: 32, 588>}, {pipeline_mode = #tpu.pipeline_mode<synchronous>, transform_indices = @transform_1, window_bounds = array<i64: 588, 160>}, {pipeline_mode = #tpu.pipeline_mode<synchronous>, transform_indices = @transform_2, window_bounds = array<i64: 1, 160>}, {transform_indices = @transform_3, window_bounds = array<i64: 32, 160>}]} {
    %c0 = arith.constant 0 : index
    %c0_0 = arith.constant 0 : index
    %0 = vector.load %arg1[%c0, %c0_0] : memref<32x588xf32, #tpu.memory_space<vmem>>, vector<32x588xf32>
    %1 = arith.truncf %0 : vector<32x588xf32> to vector<32x588xbf16>
    %c0_1 = arith.constant 0 : index
    %c0_2 = arith.constant 0 : index
    %2 = vector.load %arg2[%c0_1, %c0_2] : memref<588x160xbf16, #tpu.memory_space<vmem>>, vector<588x160xbf16>
    %cst = arith.constant dense<0.000000e+00> : vector<32x160xf32>
    %3 = tpu.matmul %1, %2, %cst {dimension_numbers = #tpu.dot_dimension_numbers<[1], [0], [0], [1], [0, 0, 1, 1], [], []>} : vector<32x588xbf16>, vector<588x160xbf16>, vector<32x160xf32> -> vector<32x160xf32>
    %c0_3 = arith.constant 0 : index
    %c0_4 = arith.constant 0 : index
    %4 = vector.load %arg3[%c0_3, %c0_4] : memref<1x160xf32, #tpu.memory_space<vmem>>, vector<1x160xf32>
    %5 = vector.broadcast %4 : vector<1x160xf32> to vector<32x160xf32>
    %6 = arith.addf %3, %5 : vector<32x160xf32>
    %c0_5 = arith.constant 0 : index
    %c0_6 = arith.constant 0 : index
    %7 = vector.load %arg4[%c0_5, %c0_6] : memref<32x160xf32, #tpu.memory_space<vmem>>, vector<32x160xf32>
    tpu.vector_store %arg4[%c0_5, %c0_6], %6 {strides = array<i32>} : memref<32x160xf32, #tpu.memory_space<vmem>>, vector<32x160xf32>,
    return
  }
  func.func @transform_0(%arg0: i32) -> (i32, i32) {
    %c0_i32 = arith.constant 0 : i32
    %c0_i32_0 = arith.constant 0 : i32
    return %arg0, %c0_i32 : i32, i32
  }
  func.func @transform_1(%arg0: i32) -> (i32, i32) {
    %c0_i32 = arith.constant 0 : i32
    %c0_i32_0 = arith.constant 0 : i32
    %c0_i32_1 = arith.constant 0 : i32
    return %c0_i32, %c0_i32_0 : i32, i32
  }
  func.func @transform_2(%arg0: i32) -> (i32, i32) {
    %c0_i32 = arith.constant 0 : i32
    %c0_i32_0 = arith.constant 0 : i32
    %c0_i32_1 = arith.constant 0 : i32
    return %c0_i32, %c0_i32_0 : i32, i32
  }
  func.func @transform_3(%arg0: i32) -> (i32, i32) {
    %c0_i32 = arith.constant 0 : i32
    %c0_i32_0 = arith.constant 0 : i32
    return %arg0, %c0_i32 : i32, i32
  }
}

</mosaic_0001>

<bundles_post_ra>
// kernel: tpu_custom_call.1
= control target key start
LH: loop header
LB: loop body
LE: loop exit
PB: predicated region body
PF: predicated region fallthrough
CT: control target
= control target key end

     0   :  { %s1238_s0 = inlined_call_operand.vmem [shape: f32[32,588], index: 0, kind: input, shape index: {}]   ;;  %s1239_s1 = inlined_call_operand.vmem [shape: bf16[588,160], index: 1, kind: input, shape index: {}]   ;;  %s1240_s2 = inlined_call_operand.vmem [shape: f32[1,160], index: 2, kind: input, shape index: {}]   ;;  %s1241_s3 = inlined_call_operand.hbm [shape: f32[32,160], index: 3, kind: output, shape index: {}]  }
   0x1   :  { %v789_v0 = vld [vmem:[%s1239_s1 + $0x74] ss:$8 sps:$4 sm:$0xff]   ;;  %v793_v2 = vld [vmem:[%s1239_s1 + $0x70] ss:$8 sps:$4 sm:$0xff]   ;;  %v795_v4 = vld [vmem:[%s1239_s1 + $0x64] ss:$8 sps:$4 sm:$0xff]  }
   0x2   :  { %v791_v1 = vld [vmem:[%s1239_s1 + $0x174] ss:$8 sps:$4 sm:$0xff]   ;;  %514 = vmatprep.subr.bf16.mxu0 %v789_v0  ;;  %v794_v3 = vld [vmem:[%s1239_s1 + $0x170] ss:$8 sps:$4 sm:$0xff]   ;;  %v797_v5 = vld [vmem:[%s1239_s1 + $0x164] ss:$8 sps:$4 sm:$0xff]  }
   0x3   :  { %567 = vmatprep.subr.bf16.mxu1 %v791_v1  ;;  %515 = vmatpush1.bf16.msra.mxu0 %v793_v2  ;;  %v799_v6 = vld [vmem:[%s1239_s1 + $0x60] ss:$8 sps:$4 sm:$0xff]   ;;  %v801_v8 = vld [vmem:[%s1239_s1 + $0x54] ss:$8 sps:$4 sm:$0xff]   ;;  %v805_v10 = vld [vmem:[%s1239_s1 + $0x50] ss:$8 sps:$4 sm:$0xff]  }
   0x4   :  { %568 = vmatpush1.bf16.msra.mxu1 %v794_v3  ;;  %516 = vmatprep.subr.bf16.mxu0 %v795_v4  ;;  %v800_v7 = vld [vmem:[%s1239_s1 + $0x160] ss:$8 sps:$4 sm:$0xff]   ;;  %v803_v9 = vld [vmem:[%s1239_s1 + $0x154] ss:$8 sps:$4 sm:$0xff]   ;;  %v806_v11 = vld [vmem:[%s1239_s1 + $0x150] ss:$8 sps:$4 sm:$0xff]  }
   0x5   :  { %569 = vmatprep.subr.bf16.mxu1 %v797_v5  ;;  %v807_v12 = vld [vmem:[%s1239_s1 + $0x44] ss:$8 sps:$4 sm:$0xff]   ;;  %v811_v14 = vld [vmem:[%s1239_s1 + $0x40] ss:$8 sps:$4 sm:$0xff]   ;;  %v813_v16 = vld [vmem:[%s1239_s1 + $0x34] ss:$8 sps:$4 sm:$0xff]  }
   0x6   :  { %v809_v13 = vld [vmem:[%s1239_s1 + $0x144] ss:$8 sps:$4 sm:$0xff]   ;;  %v812_v15 = vld [vmem:[%s1239_s1 + $0x140] ss:$8 sps:$4 sm:$0xff]   ;;  %v815_v17 = vld [vmem:[%s1239_s1 + $0x134] ss:$8 sps:$4 sm:$0xff]  }
   0x7   :  { %517 = vmatpush1.bf16.msra.mxu0 %v799_v6  ;;  %v817_v18 = vld [vmem:[%s1239_s1 + $0x30] ss:$8 sps:$4 sm:$0xff]   ;;  %v819_v20 = vld [vmem:[%s1239_s1 + $0x24] ss:$8 sps:$4 sm:$0xff]   ;;  %v823_v22 = vld [vmem:[%s1239_s1 + $0x20] ss:$8 sps:$4 sm:$0xff]  }
   0x8   :  { %570 = vmatpush1.bf16.msra.mxu1 %v800_v7  ;;  %518 = vmatprep.subr.bf16.mxu0 %v801_v8  ;;  %v818_v19 = vld [vmem:[%s1239_s1 + $0x130] ss:$8 sps:$4 sm:$0xff]   ;;  %v821_v21 = vld [vmem:[%s1239_s1 + $0x124] ss:$8 sps:$4 sm:$0xff]   ;;  %v824_v23 = vld [vmem:[%s1239_s1 + $0x120] ss:$8 sps:$4 sm:$0xff]  }
   0x9   :  { %571 = vmatprep.subr.bf16.mxu1 %v803_v9  ;;  %v825_v24 = vld [vmem:[%s1239_s1 + $0x14] ss:$8 sps:$4 sm:$0xff]   ;;  %v829_v26 = vld [vmem:[%s1239_s1 + $0x10] ss:$8 sps:$4 sm:$0xff]   ;;  %v831_v28 = vld [vmem:[%s1239_s1 + $0x4] ss:$8 sps:$4 sm:$0xff]  }
   0xa   :  { %v827_v25 = vld [vmem:[%s1239_s1 + $0x114] ss:$8 sps:$4 sm:$0xff]   ;;  %v830_v27 = vld [vmem:[%s1239_s1 + $0x110] ss:$8 sps:$4 sm:$0xff]   ;;  %v833_v29 = vld [vmem:[%s1239_s1 + $0x104] ss:$8 sps:$4 sm:$0xff]  }
   0xb   :  { %519 = vmatpush1.bf16.msra.mxu0 %v805_v10  ;;  %v835_v30 = vld [vmem:[%s1239_s1] ss:$8 sps:$4 sm:$0xff]   ;;  %v837_v32 = vld [vmem:[%s1239_s1 + $0xf4] ss:$8 sps:$4 sm:$0xff]   ;;  %v841_v34 = vld [vmem:[%s1239_s1 + $0xf0] ss:$8 sps:$4 sm:$0xff]  }
   0xc   :  { %572 = vmatpush1.bf16.msra.mxu1 %v806_v11  ;;  %520 = vmatprep.subr.bf16.mxu0 %v807_v12  ;;  %v836_v31 = vld [vmem:[%s1239_s1 + $0x100] ss:$8 sps:$4 sm:$0xff]   ;;  %v839_v33 = vld [vmem:[%s1239_s1 + $0x1f4] ss:$8 sps:$4 sm:$0xff]   ;;  %v842_v35 = vld [vmem:[%s1239_s1 + $0x1f0] ss:$8 sps:$4 sm:$0xff]  }
   0xd   :  { %573 = vmatprep.subr.bf16.mxu1 %v809_v13  ;;  %v843_v36 = vld [vmem:[%s1239_s1 + $0xe4] ss:$8 sps:$4 sm:$0xff]   ;;  %v847_v38 = vld [vmem:[%s1239_s1 + $0xe0] ss:$8 sps:$4 sm:$0xff]   ;;  %v849_v40 = vld [vmem:[%s1239_s1 + $0xd4] ss:$8 sps:$4 sm:$0xff]  }
   0xe   :  { %v845_v37 = vld [vmem:[%s1239_s1 + $0x1e4] ss:$8 sps:$4 sm:$0xff]   ;;  %v848_v39 = vld [vmem:[%s1239_s1 + $0x1e0] ss:$8 sps:$4 sm:$0xff]   ;;  %v851_v41 = vld [vmem:[%s1239_s1 + $0x1d4] ss:$8 sps:$4 sm:$0xff]  }
   0xf   :  { %521 = vmatpush1.bf16.msra.mxu0 %v811_v14  ;;  %v853_v42 = vld [vmem:[%s1239_s1 + $0xd0] ss:$8 sps:$4 sm:$0xff]   ;;  %v855_v44 = vld [vmem:[%s1239_s1 + $0xc4] ss:$8 sps:$4 sm:$0xff]   ;;  %v859_v50 = vld [vmem:[%s1239_s1 + $0xc0] ss:$8 sps:$4 sm:$0xff]  }
  0x10   :  { %574 = vmatpush1.bf16.msra.mxu1 %v812_v15  ;;  %522 = vmatprep.subr.bf16.mxu0 %v813_v16  ;;  %v854_v43 = vld [vmem:[%s1239_s1 + $0x1d0] ss:$8 sps:$4 sm:$0xff]   ;;  %v857_v45 = vld [vmem:[%s1239_s1 + $0x1c4] ss:$8 sps:$4 sm:$0xff]   ;;  %v860_v51 = vld [vmem:[%s1239_s1 + $0x1c0] ss:$8 sps:$4 sm:$0xff]  }
  0x11   :  { %575 = vmatprep.subr.bf16.mxu1 %v815_v17  ;;  %v17_v46 = vld [vmem:[%s1238_s0 + $0x8] sm:$0xff]  ;;  %v22_v47 = vld [vmem:[%s1238_s0 + $0x30] sm:$0xff]  ;;  %v19_v48 = vld [vmem:[%s1238_s0 + $0x18] sm:$0xff] }
  0x12   :  { %v24_v49 = vld [vmem:[%s1238_s0 + $0x40] sm:$0xff]  ;;  %v861_v52 = vld [vmem:[%s1239_s1 + $0xb4] ss:$8 sps:$4 sm:$0xff]   ;;  %v37_v53 = vpack.c.bf16 %v22_v47, %v17_v46  ;;  %v865_v56 = vld [vmem:[%s1239_s1 + $0xb0] ss:$8 sps:$4 sm:$0xff]  }
  0x13   :  { %523 = vmatpush1.bf16.msra.mxu0 %v817_v18  ;;  %v39_v54 = vpack.c.bf16 %v24_v49, %v19_v48  ;;  %v863_v55 = vld [vmem:[%s1239_s1 + $0x1b4] ss:$8 sps:$4 sm:$0xff]   ;;  %v866_v57 = vld [vmem:[%s1239_s1 + $0x1b0] ss:$8 sps:$4 sm:$0xff]   ;;  %v867_v58 = vld [vmem:[%s1239_s1 + $0xa4] ss:$8 sps:$4 sm:$0xff]  }
  0x14   :  { %576 = vmatpush1.bf16.msra.mxu1 %v818_v19  ;;  %524 = vmatprep.subr.bf16.mxu0 %v819_v20  ;;  %v869_v59 = vld [vmem:[%s1239_s1 + $0x1a4] ss:$8 sps:$4 sm:$0xff]   ;;  %v871_v60 = vld [vmem:[%s1239_s1 + $0xa0] ss:$8 sps:$4 sm:$0xff]   ;;  %v873_v62 = vld [vmem:[%s1239_s1 + $0x94] ss:$8 sps:$4 sm:$0xff]  }
  0x15   :  { %577 = vmatprep.subr.bf16.mxu1 %v821_v21  ;;  %546 = vmatprep.mubr.bf16.mxu0 %v37_v53  ;;  %v872_v61 = vld [vmem:[%s1239_s1 + $0x1a0] ss:$8 sps:$4 sm:$0xff]   ;;  %v875_v63 = vld [vmem:[%s1239_s1 + $0x194] ss:$8 sps:$4 sm:$0xff]   ;;  %v877_v0 = vld [vmem:[%s1239_s1 + $0x90] ss:$8 sps:$4 sm:$0xff]  }
  0x16   :  { %599 = vmatprep.mubr.bf16.mxu1 %v39_v54  ;;  %v878_v1 = vld [vmem:[%s1239_s1 + $0x190] ss:$8 sps:$4 sm:$0xff]  }
  0x17   :  { %525 = vmatpush1.bf16.msra.mxu0 %v823_v22 }
  0x18   :  { %578 = vmatpush1.bf16.msra.mxu1 %v824_v23  ;;  %526 = vmatprep.subr.bf16.mxu0 %v825_v24 }
  0x19   :  { %579 = vmatprep.subr.bf16.mxu1 %v827_v25 }
  0x1b   :  { %527 = vmatpush1.bf16.msra.mxu0 %v829_v26 }
  0x1c   :  { %580 = vmatpush1.bf16.msra.mxu1 %v830_v27  ;;  %528 = vmatprep.subr.bf16.mxu0 %v831_v28 }
  0x1d   :  { %581 = vmatprep.subr.bf16.mxu1 %v833_v29 }
  0x1f   :  { %529 = vmatpush1.bf16.msra.mxu0 %v835_v30 }
  0x20   :  { %582 = vmatpush1.bf16.msra.mxu1 %v836_v31  ;;  %530 = vmatprep.subr.bf16.mxu0 %v837_v32 }
  0x21   :  { %583 = vmatprep.subr.bf16.mxu1 %v839_v33 }
  0x23   :  { %531 = vmatpush2.bf16.msra.mxu0 %v841_v34 }
  0x24   :  { %584 = vmatpush2.bf16.msra.mxu1 %v842_v35  ;;  %532 = vmatprep.subr.bf16.mxu0 %v843_v36 }
  0x25   :  { %585 = vmatprep.subr.bf16.mxu1 %v845_v37 }
  0x27   :  { %533 = vmatpush2.bf16.msra.mxu0 %v847_v38 }
  0x28   :  { %586 = vmatpush2.bf16.msra.mxu1 %v848_v39  ;;  %534 = vmatprep.subr.bf16.mxu0 %v849_v40 }
  0x29   :  { %587 = vmatprep.subr.bf16.mxu1 %v851_v41 }
  0x2b   :  { %535 = vmatpush2.bf16.msra.mxu0 %v853_v42 }
  0x2c   :  { %588 = vmatpush2.bf16.msra.mxu1 %v854_v43  ;;  %536 = vmatprep.subr.bf16.mxu0 %v855_v44 }
  0x2d   :  { %589 = vmatprep.subr.bf16.mxu1 %v857_v45 }
  0x2f   :  { %537 = vmatpush2.bf16.msra.mxu0 %v859_v50 }
  0x30   :  { %590 = vmatpush2.bf16.msra.mxu1 %v860_v51  ;;  %538 = vmatprep.subr.bf16.mxu0 %v861_v52 }
  0x31   :  { %591 = vmatprep.subr.bf16.mxu1 %v863_v55 }
  0x33   :  { %539 = vmatpush2.bf16.msra.mxu0 %v865_v56 }
  0x34   :  { %592 = vmatpush2.bf16.msra.mxu1 %v866_v57  ;;  %540 = vmatprep.subr.bf16.mxu0 %v867_v58 }
  0x35   :  { %593 = vmatprep.subr.bf16.mxu1 %v869_v59 }
  0x37   :  { %541 = vmatpush2.bf16.msra.mxu0 %v871_v60 }
  0x38   :  { %594 = vmatpush2.bf16.msra.mxu1 %v872_v61 }
  0x39   :  { %8 = vsyncpa [#allocation3], 0  ;;  %542 = vmatprep.subr.bf16.mxu0 %v873_v62  ;;  %595 = vmatprep.subr.bf16.mxu1 %v875_v63  ;;  %v879_v2 = vld [vmem:[%s1239_s1 + $0x84] ss:$8 sps:$4 sm:$0xff]   ;;  %v883_v4 = vld [vmem:[%s1239_s1 + $0x80] ss:$8 sps:$4 sm:$0xff]   ;;  %v122_v42 = vlaneseq }
  0x3a   :  { %v881_v3 = vld [vmem:[%s1239_s1 + $0x184] ss:$8 sps:$4 sm:$0xff]   ;;  %v884_v5 = vld [vmem:[%s1239_s1 + $0x180] ss:$8 sps:$4 sm:$0xff]   ;;  %v18_v8 = vld [vmem:[%s1238_s0 + $0x10] sm:$0xff]  ;;  %vm507_vm0 = vcmask 1045504  }
  0x3b   :  { %v16_v6 = vld [vmem:[%s1238_s0] sm:$0xff]  ;;  %543 = vmatpush2.bf16.msra.mxu0 %v877_v0  ;;  %v21_v7 = vld [vmem:[%s1238_s0 + $0x28] sm:$0xff]  ;;  %v23_v9 = vld [vmem:[%s1238_s0 + $0x38] sm:$0xff]  ;;  %v922_v34 = vmov 0   ;;  %vm500_vm1 = vcmask 621568   ;;  %v123_v47 = vshrl.u32 %v122_v42, 7 }
  0x3c   :  { %596 = vmatpush2.bf16.msra.mxu1 %v878_v1  ;;  %544 = vmatprep.subr.bf16.mxu0 %v879_v2  ;;  %v885_v10 = vld [vmem:[%s1239_s1 + $0x244] ss:$8 sps:$4 sm:$0x3f]   ;;  %v887_v11 = vld [vmem:[%s1239_s1 + $0x240] ss:$8 sps:$4 sm:$0x3f]   ;;  %v36_v13 = vpack.c.bf16 %v21_v7, %v16_v6  ;;  %v38_v14 = vpack.c.bf16 %v23_v9, %v18_v8 }
  0x3d   :  { %597 = vmatprep.subr.bf16.mxu1 %v881_v3  ;;  %v27_v12 = vld [vmem:[%s1238_s0 + $0x58] sm:$0xff]  ;;  %v32_v15 = vld [vmem:[%s1238_s0 + $0x80] sm:$0xff]  ;;  %v29_v16 = vld [vmem:[%s1238_s0 + $0x68] sm:$0xff]  ;;  %v509_v18 = vsel %vm507_vm0, %v887_v11, 0  ;;  %v124_v52 = vsub.s32 0, %v123_v47  ;;  %v128_v54 = vsub.s32 1, %v123_v47 }
  0x3e   :  { %v34_v17 = vld [vmem:[%s1238_s0 + $0x90] sm:$0xff]  ;;  %v42_v20 = vpack.c.bf16 %v32_v15, %v27_v12  ;;  %v31_v24 = vld [vmem:[%s1238_s0 + $0x78] sm:$0xff]  ;;  %v28_v25 = vld [vmem:[%s1238_s0 + $0x60] sm:$0xff]  ;;  %vm674_vm2 = vcmask 261120  }
  0x3f   :  { %545 = vmatpush2.bf16.msra.mxu0 %v883_v4  ;;  %v890_v19 = vld [vmem:[%s1239_s1 + $0x234] ss:$8 sps:$4 sm:$0xff]   ;;  %v44_v21 = vpack.c.bf16 %v34_v17, %v29_v16  ;;  %v888_v22 = vld [vmem:[%s1239_s1 + $0x230] ss:$8 sps:$4 sm:$0xff]   ;;  %v33_v26 = vld [vmem:[%s1238_s0 + $0x88] sm:$0xff] }
  0x40   :  { %598 = vmatpush2.bf16.msra.mxu1 %v884_v5  ;;  %772 = vmatprep.subr.msk.bf16.mxu0 %vm507_vm0, %v885_v10  ;;  %v26_v23 = vld [vmem:[%s1238_s0 + $0x50] sm:$0xff]  ;;  %v893_v27 = vld [vmem:[%s1239_s1 + $0x224] ss:$8 sps:$4 sm:$0xff]   ;;  %v43_v29 = vpack.c.bf16 %v33_v26, %v28_v25  ;;  %v891_v30 = vld [vmem:[%s1239_s1 + $0x220] ss:$8 sps:$4 sm:$0xff]  }
  0x41   :  { %775 = vmatprep.subr.msk.bf16.mxu1 %vm507_vm0, %v885_v10  ;;  %v41_v28 = vpack.c.bf16 %v31_v24, %v26_v23  ;;  %v896_v31 = vld [vmem:[%s1239_s1 + $0x214] ss:$8 sps:$4 sm:$0xff]   ;;  %v894_v32 = vld [vmem:[%s1239_s1 + $0x210] ss:$8 sps:$4 sm:$0xff]   ;;  %v899_v33 = vld [vmem:[%s1239_s1 + $0x204] ss:$8 sps:$4 sm:$0xff]  }
  0x42   :  { %547 = vmatmul.mubr.bf16.vlgmr.msra.gmra.mxu0 %v36_v13  ;;  %v897_v35 = vld [vmem:[%s1239_s1 + $0x200] ss:$8 sps:$4 sm:$0xff]   ;;  %v30_v38 = vld [vmem:[%s1238_s0 + $0x70] sm:$0xff]  ;;  %v35_v39 = vld [vmem:[%s1238_s0 + $0x98] sm:$0xff] }
  0x43   :  { %600 = vmatmul.mubr.bf16.vlgmr.msra.gmra.mxu1 %v38_v14  ;;  %627 = vmatpush1.bf16.msra.mxu0 %v509_v18  ;;  %v20_v36 = vld [vmem:[%s1238_s0 + $0x20] sm:$0xff]  ;;  %v25_v37 = vld [vmem:[%s1238_s0 + $0x48] sm:$0xff]  ;;  %v45_v41 = vpack.c.bf16 %v35_v39, %v30_v38 }
  0x44   :  { %780 = vmatpush1.bf16.msra.mxu1 %v509_v18  ;;  %628 = vmatprep.subr.bf16.mxu0 %v890_v19  ;;  %v40_v40 = vpack.c.bf16 %v25_v37, %v20_v36  ;;  %v120_v53 = vld [vmem:[%s1240_s2] sm:$0x3]  ;;  %s923_s2 = smov [#allocation2]  }
  0x45   :  { %776 = vmatprep.subr.bf16.mxu1 %v890_v19  ;;  %556 = vmatprep.mubr.bf16.mxu0 %v42_v20  ;;  %v125_v59 = vrot.slane %v120_v53, %v124_v52  ;;  %v129_v60 = vrot.slane %v120_v53, %v128_v54  ;;  %s687_s11 = sshll.u32 %s923_s2, 4  ;;  %s688_s11 = int_to_ptr.vmem [resolvable:$true] %s687_s11 }
  0x46   :  { %609 = vmatprep.mubr.bf16.mxu1 %v44_v21  ;;  %s900_s12 = scalar_lea.vmem %s688_s11, 1024  ;;  %p905_p1 = scmp.lt.s32.totalorder %s688_s11, %s688_s11 }
  0x47   :  { %629 = vmatpush1.bf16.msra.mxu0 %v888_v22  ;;  %p901_p0 = scmp.ne.s32.totalorder %s688_s11, %s900_s12  ;;  %p906_p2 = scmp.lt.s32.totalorder %s900_s12, %s900_s12 }
  0x48   :  { %781 = vmatpush1.bf16.msra.mxu1 %v888_v22  ;;  %630 = vmatprep.subr.bf16.mxu0 %v893_v27 }
  0x49   :  { %777 = vmatprep.subr.bf16.mxu1 %v893_v27  ;;  %p907_p3 = por %p906_p2, %p905_p1 }
  0x4a   :  { %557 = vmatmul.mubr.bf16.gmra.mxu0 %v41_v28 }
  0x4b   :  { %610 = vmatmul.mubr.bf16.gmra.mxu1 %v43_v29  ;;  %631 = vmatpush1.bf16.msra.mxu0 %v891_v30  ;;  %p908_p4 = pnand %p907_p3, %p901_p0 }
  0x4c   :  { %782 = vmatpush1.bf16.msra.mxu1 %v891_v30  ;;  %632 = vmatprep.subr.bf16.mxu0 %v896_v31 }
  0x4d   :  { %778 = vmatprep.subr.bf16.mxu1 %v896_v31  ;;  %652 = vmatprep.mubr.bf16.mxu0 %v922_v34 }
  0x4e   :  { %662 = vmatprep.mubr.bf16.mxu1 %v922_v34 }
  0x4f   :  { %633 = vmatpush1.bf16.msra.mxu0 %v894_v32 }
  0x50   :  { %783 = vmatpush1.bf16.msra.mxu1 %v894_v32  ;;  %634 = vmatprep.subr.bf16.mxu0 %v899_v33 }
  0x51   :  { %779 = vmatprep.subr.bf16.mxu1 %v899_v33 }
  0x53   :  { %635 = vmatpush1.bf16.msra.mxu0 %v897_v35 }
  0x54   :  { %784 = vmatpush1.bf16.msra.mxu1 %v897_v35 }
  0x56   :  { %773 = vmatmul.mubr.msk.bf16.vlgmr.msra.gmra.mxu0 %vm500_vm1, %v40_v40 }
  0x57   :  { %774 = vmatmul.mubr.msk.bf16.vlgmr.msra.gmra.mxu1 %vm500_vm1, %v45_v41 }
 0x102   :  { %v548_v43 = vpop.f32.mrf.mxu0 }
 0x103   :  { %v601_v44 = vpop.f32.mrf.mxu1  ;;  %v549_v63 = vadd.f32 %v548_v43, %v125_v59 }
 0x104   :  { %v550_v45 = vpop.f32.mrf.mxu0 }
 0x105   :  { %v603_v46 = vpop.f32.mrf.mxu1  ;;  %v551_v1 = vadd.f32 %v550_v45, %v129_v60  ;;  %v602_v5 = vadd.f32 %v601_v44, %v549_v63 }
 0x106   :  { %v552_v48 = vpop.f32.mrf.mxu0 }
 0x107   :  { %v605_v49 = vpop.f32.mrf.mxu1  ;;  %v553_v6 = vadd.f32 %v552_v48, %v125_v59  ;;  %v604_v9 = vadd.f32 %v603_v46, %v551_v1 }
 0x108   :  { %v554_v50 = vpop.f32.mrf.mxu0 }
 0x109   :  { %v607_v51 = vpop.f32.mrf.mxu1  ;;  %v555_v10 = vadd.f32 %v554_v50, %v129_v60  ;;  %v606_v19 = vadd.f32 %v605_v49, %v553_v6 }
 0x10a   :  { %v558_v55 = vpop.f32.mrf.mxu0 }
 0x10b   :  { %v611_v56 = vpop.f32.mrf.mxu1  ;;  %v559_v0 = vadd.f32 %v558_v55, %v125_v59  ;;  %v608_v25 = vadd.f32 %v607_v51, %v555_v10 }
 0x10c   :  { %v560_v57 = vpop.f32.mrf.mxu0 }
 0x10d   :  { %v613_v58 = vpop.f32.mrf.mxu1  ;;  %v561_v2 = vadd.f32 %v560_v57, %v129_v60  ;;  %v612_v7 = vadd.f32 %v611_v56, %v559_v0 }
 0x10e   :  { %v562_v61 = vpop.f32.mrf.mxu0 }
 0x10f   :  { %v615_v62 = vpop.f32.mrf.mxu1  ;;  %v563_v8 = vadd.f32 %v562_v61, %v125_v59  ;;  %v614_v13 = vadd.f32 %v613_v58, %v561_v2 }
 0x110   :  { %v564_v3 = vpop.f32.mrf.mxu0 }
 0x111   :  { %v617_v4 = vpop.f32.mrf.mxu1  ;;  %v565_v14 = vadd.f32 %v564_v3, %v129_v60  ;;  %v616_v20 = vadd.f32 %v615_v62, %v563_v8 }
 0x113   :  { %v618_v26 = vadd.f32 %v617_v4, %v565_v14 }
 0x116   :  { %v654_v11 = vpop.f32.mrf.mxu0 }
 0x117   :  { %v664_v12 = vpop.f32.mrf.mxu1  ;;  %v655_v15 = vadd.f32 %v654_v11, %v602_v5 }
 0x118   :  { %v665_v16 = vadd.f32 %v664_v12, %v612_v7  ;;  %v656_v17 = vpop.f32.mrf.mxu0 }
 0x119   :  { %v666_v18 = vpop.f32.mrf.mxu1  ;;  %673 = vst [vmem:[#allocation2] sm:$0xff] %v655_v15  ;;  %v657_v21 = vadd.f32 %v656_v17, %v604_v9 }
 0x11a   :  { %678 = vst [vmem:[#allocation2 + $0x20] sm:$0xff] %v665_v16  ;;  %v667_v22 = vadd.f32 %v666_v18, %v614_v13  ;;  %v658_v23 = vpop.f32.mrf.mxu0 }
 0x11b   :  { %v668_v24 = vpop.f32.mrf.mxu1  ;;  %675 = vst.msk [vmem:[#allocation2 + $0x8] sm:$0xff] %vm674_vm2, %v657_v21  ;;  %v659_v27 = vadd.f32 %v658_v23, %v606_v19 }
 0x11c   :  { %679 = vst.msk [vmem:[#allocation2 + $0x28] sm:$0xff] %vm674_vm2, %v667_v22  ;;  %v669_v28 = vadd.f32 %v668_v24, %v616_v20  ;;  %v660_v29 = vpop.f32.mrf.mxu0 }
 0x11d   :  { %v670_v30 = vpop.f32.mrf.mxu1  ;;  %676 = vst [vmem:[#allocation2 + $0x10] sm:$0xff] %v659_v27  ;;  %v661_v31 = vadd.f32 %v660_v29, %v608_v25 }
 0x11e   :  { %680 = vst [vmem:[#allocation2 + $0x30] sm:$0xff] %v669_v28  ;;  %v671_v32 = vadd.f32 %v670_v30, %v618_v26 }
 0x11f   :  { %677 = vst.msk [vmem:[#allocation2 + $0x18] sm:$0xff] %vm674_vm2, %v661_v31 }
 0x120   :  { %681 = vst.msk [vmem:[#allocation2 + $0x38] sm:$0xff] %vm674_vm2, %v671_v32 }
 0x121   :  { %911 = shalt.err (!%p908_p4)
}
 0x122   :  { %s924_s13 = smov 256   ;;  %s925_s14 = smov 16  }
 0x123   :  { %693 = dma.vmem_to_hbm [thread:$0]  %s688_s11, 1024, %s1241_s3, [#allocation3], %s924_s13, %s924_s13, %s925_s14  }
 0x124   :  { %920 = dma.done.wait [#allocation3], 1024  }
 0x125   :  { %921 = vsyncadd [#allocation3], 4294966272 }
 0x126   :  { %697 = vsyncpa [#allocation3], 1 }

</bundles_post_ra>
